<compile_context>
chip_gen: v5e
topology: v5e:2x2
jax: 0.10.0
libtpu: 0.0.40
codegen_flags: <defaults>
</compile_context>

<pallas_src>
import functools
import math

import numpy as np
import jax
import jax.numpy as jnp
from jax.experimental import pallas as pl
from jax.experimental.pallas import tpu as pltpu


def _round_up(x, m):
    return ((x + m - 1) // m) * m


def _round_down(x, m):
    return (x // m) * m


# ---------------------------------------------------------------------------
# Kernel: fused quaternion 1x1 conv (over the space-to-depth concat) + SiLU.
# ---------------------------------------------------------------------------
def _focus_qconv_kernel(w_ref, x_ref, o_ref, *, apply_silu, chunk):
    # w_ref: (c2, K)      fused weight, VMEM-resident across the whole grid
    # x_ref: (1, K, tn)   lane-dense activation tile (bf16/f32)
    # o_ref: (1, c2, tn)  lane-dense output tile
    w = w_ref[...]
    n = x_ref.shape[-1]
    for start in range(0, n, chunk):          # lane-chunked to bound live f32 regs
        sl = slice(start, start + chunk)
        y = jnp.dot(w, x_ref[0, :, sl], preferred_element_type=jnp.float32)
        # TODO(synk): nn.IQBN has no definition in the spec; at default init it is an
        # identity affine transform, so it is folded away.  For trained checkpoints
        # fold its scale into W_hat and add its shift as a bias here.
        if apply_silu:
            # SiLU in f32: y * sigmoid(y); reciprocal on the EUP slot (free).
            y = y * pl.reciprocal(1.0 + jnp.exp(-y), approx=True)
        o_ref[0, :, sl] = y.astype(o_ref.dtype)


class FocusPallas:
    """Focus(c1, c2) for 5-D quaternion inputs [B, c1//4, 4, H, W]."""

    def __init__(self, key, c1, c2, k=1, s=1, p=None, g=1, act=True,
                 io_dtype=jnp.bfloat16, max_tile_n=4096, epilogue_chunk=512,
                 vmem_budget_bytes=16 * 1024 * 1024):
        # TODO(synk): only the Focus defaults k=1, s=1, g=1 are supported; a general k
        # would need an im2col / conv kernel.
        assert k == 1 and s == 1 and g == 1
        assert c1 % 4 == 0 and c2 % 4 == 0
        assert max_tile_n % 128 == 0 and epilogue_chunk % 128 == 0
        self.c1, self.c2 = c1, c2
        self.apply_silu = (act is True)
        self.io_dtype = jnp.dtype(io_dtype)
        self.max_tile_n = max_tile_n
        self.epilogue_chunk = epilogue_chunk
        self.vmem_budget_bytes = vmem_budget_bytes

        cq_in = c1 // 4        # quaternion channels of the Focus input
        c_in = c1              # per-component in channels of the 1x1 QConv (post concat)
        c_out = c2 // 4        # per-component out channels

        # kaiming_uniform(a=sqrt(5)) on a 1x1 kernel == U(-1/sqrt(fan_in), 1/sqrt(fan_in))
        bound = 1.0 / math.sqrt(c_in)
        ks = jax.random.split(key, 4)
        ws = jnp.stack([jax.random.uniform(ks[q], (c_out, c_in), jnp.float32,
                                           -bound, bound)
                        for q in range(4)])          # (4, c_out, c_in): r, i, j, k
        self.component_weights = ws                   # kept for the pure-JAX reference

        # Quaternion sign fusion — matches QConv.forward's in-place arithmetic:
        #   out_r = r - i - j - k ; out_i = r - 2k ; out_j = r - 2i ; out_k = r - 2j
        coeff = jnp.array([[1., -1., -1., -1.],
                           [1.,  0.,  0., -2.],
                           [1., -2.,  0.,  0.],
                           [1.,  0., -2.,  0.]], jnp.float32)   # [q_out, q_in]
        # rows ordered (c_out, q_out), cols ordered (q_in, concat_channel)
        w_conv = jnp.einsum('pq,qoc->opqc', coeff, ws).reshape(c2, 4 * c_in)

        # Column permutation: kernel K-order is (c, q_in, h_off, w_off); the concat
        # slice order in Focus is [(0,0),(1,0),(0,1),(1,1)] i.e. s = 2*w_off + h_off,
        # and the concat channel of component q is s*cq_in + c.
        perm = np.empty(4 * c_in, dtype=np.int32)
        for c in range(cq_in):
            for q in range(4):
                for ho in range(2):
                    for wo in range(2):
                        k_new = ((c * 4 + q) * 2 + ho) * 2 + wo
                        slc = 2 * wo + ho
                        perm[k_new] = q * c_in + slc * cq_in + c
        # Fused weight precomputed in the runtime dtype (no per-call XLA cast).
        self.w_hat = w_conv[:, perm].astype(self.io_dtype)      # (c2, 4*c1)

    def __call__(self, x):
        B, cq, Q, H, W = x.shape
        assert Q == 4 and cq * 4 == self.c1 and H % 2 == 0 and W % 2 == 0
        H2, W2 = H // 2, W // 2
        N = H2 * W2
        K = 4 * self.c1
        R = self.c2
        lane = 128
        itemsize = self.io_dtype.itemsize

        # --- tile selection: lane-dense, VMEM-budgeted, megacore-balanced ---------
        per_lane = 2 * (K + R) * itemsize           # double-buffered in+out bytes/lane
        tn = _round_down(max(self.vmem_budget_bytes // per_lane, lane), lane)
        tn = min(tn, self.max_tile_n)
        tn = min(tn, _round_up(N, lane))
        if B == 1 and _round_up(N, lane) >= 2 * lane:   # keep >=2 tiles for 2-TC chips
            tn = min(tn, _round_up(pl.cdiv(N, 2), lane))
        tn = max(tn, lane)
        grid_n = pl.cdiv(N, tn)
        n_pad = grid_n * tn                          # unmasked vst on every tile
        chunk = self.epilogue_chunk if tn % self.epilogue_chunk == 0 else tn

        # --- layout glue: ONE fused XLA pass (downcast + space-to-depth transpose)
        # producing the lane-dense (B, K, N) slab consumed by the kernel. -----------
        xh = x.astype(self.io_dtype)                              # cast first (bf16 write)
        xr = xh.reshape(B, cq, 4, H2, 2, W2, 2)
        xr = jnp.transpose(xr, (0, 1, 2, 4, 6, 3, 5))             # (B, c, q, ho, wo, H2, W2)
        xmat = xr.reshape(B, K, N)
        if n_pad != N:
            xmat = jnp.pad(xmat, ((0, 0), (0, 0), (0, n_pad - N)))

        kernel = functools.partial(_focus_qconv_kernel,
                                   apply_silu=self.apply_silu, chunk=chunk)
        out = pl.pallas_call(
            kernel,
            out_shape=jax.ShapeDtypeStruct((B, R, n_pad), self.io_dtype),
            grid=(grid_n, B),
            in_specs=[
                pl.BlockSpec((R, K), lambda n, b: (0, 0)),          # fused weight, resident
                pl.BlockSpec((1, K, tn), lambda n, b: (b, 0, n)),   # activation tile
            ],
            out_specs=pl.BlockSpec((1, R, tn), lambda n, b: (b, 0, n)),
            compiler_params=pltpu.CompilerParams(
                dimension_semantics=("parallel", "parallel"),
                vmem_limit_bytes=32 * 1024 * 1024),
        )(self.w_hat, xmat)

        if n_pad != N:
            out = out[:, :, :N]
        # rows are (c_out, quaternion) -> pure reshape, no transpose/stack needed.
        return out.reshape(B, self.c2 // 4, 4, H2, W2)


# ---------------------------------------------------------------------------
# Pure-JAX reference (mirrors the PyTorch code literally; correctness only)
# ---------------------------------------------------------------------------
def reference(x, ws, apply_silu=True):
    y = jnp.concatenate([x[..., ::2, ::2], x[..., 1::2, ::2],
                         x[..., ::2, 1::2], x[..., 1::2, 1::2]], axis=1)
    conv = lambda xq, w: jnp.einsum('oc,bchw->bohw', w, xq,
                                    precision=jax.lax.Precision.HIGHEST)
    r = conv(y[:, :, 0], ws[0])
    i = conv(y[:, :, 1], ws[1])
    j = conv(y[:, :, 2], ws[2])
    k = conv(y[:, :, 3], ws[3])
    out_r = r - i - j - k                 # in-place torch semantics: r_conv mutated
    out_i = out_r + i + j - k
    out_j = out_r - i + j + k
    out_k = out_r + i - j + k
    out = jnp.stack([out_r, out_i, out_j, out_k], axis=2)
    # IQBN at default init == identity
    if apply_silu:
        out = out * jax.nn.sigmoid(out)
    return out


if __name__ == "__main__":
    key = jax.random.PRNGKey(0)
    kx, kw = jax.random.split(key)

    B, c1, c2, H, W = 2, 16, 32, 16, 16
    x = jax.random.normal(kx, (B, c1 // 4, 4, H, W), jnp.float32)

    ref = None
    # Check both the full-precision-storage path and the recommended bf16 path.
    # Tolerances account for bf16 storage / MXU bf16-pass products / approx recip;
    # structural bugs (wrong perm / signs) would produce O(1) errors.
    for io_dtype, tol in ((jnp.float32, 8e-2), (jnp.bfloat16, 2e-1)):
        mod = FocusPallas(kw, c1, c2, io_dtype=io_dtype)
        out = jax.block_until_ready(mod(x))
        assert out.shape == (B, c2 // 4, 4, H // 2, W // 2), out.shape
        if ref is None:
            ref = reference(x, mod.component_weights, apply_silu=True)
        err = float(jnp.max(jnp.abs(out.astype(jnp.float32) - ref)))
        assert err < tol, (str(io_dtype), err)

    print("KERNEL_OK")
</pallas_src>

<mosaic_0001>
module attributes {stable_mosaic.version = 11 : i64} {
  func.func @_focus_qconv_kernel(%arg0: i32, %arg1: i32, %arg2: memref<32x64xf32, #tpu.memory_space<vmem>>, %arg3: memref<1x64x128xf32, #tpu.memory_space<vmem>>, %arg4: memref<1x32x128xf32, #tpu.memory_space<vmem>>) attributes {dimension_semantics = [#tpu.dimension_semantics<parallel>, #tpu.dimension_semantics<parallel>], iteration_bounds = array<i64: 1, 2>, scalar_prefetch = 0 : i64, scratch_operands = 0 : i64, tpu.core_type = #tpu.core_type<tc>, window_params = [{pipeline_mode = #tpu.pipeline_mode<synchronous>, transform_indices = @transform_0, window_bounds = array<i64: 32, 64>}, {transform_indices = @transform_1, window_bounds = array<i64: 1, 64, 128>}, {transform_indices = @transform_2, window_bounds = array<i64: 1, 32, 128>}]} {
    %c0 = arith.constant 0 : index
    %c0_0 = arith.constant 0 : index
    %0 = vector.load %arg2[%c0, %c0_0] : memref<32x64xf32, #tpu.memory_space<vmem>>, vector<32x64xf32>
    %c0_1 = arith.constant 0 : index
    %c0_2 = arith.constant 0 : index
    %c0_3 = arith.constant 0 : index
    %1 = vector.load %arg3[%c0_1, %c0_2, %c0_3] : memref<1x64x128xf32, #tpu.memory_space<vmem>>, vector<1x64x128xf32>
    %2 = vector.shape_cast %1 : vector<1x64x128xf32> to vector<64x128xf32>
    %cst = arith.constant dense<0.000000e+00> : vector<32x128xf32>
    %3 = tpu.matmul %0, %2, %cst {dimension_numbers = #tpu.dot_dimension_numbers<[1], [0], [0], [1], [0, 0, 1, 1], [], []>} : vector<32x64xf32>, vector<64x128xf32>, vector<32x128xf32> -> vector<32x128xf32>
    %cst_4 = arith.constant 0.000000e+00 : f32
    %4 = vector.broadcast %cst_4 : f32 to vector<32x128xf32>
    %5 = arith.subf %4, %3 : vector<32x128xf32>
    %6 = math.exp %5 : vector<32x128xf32>
    %cst_5 = arith.constant 1.000000e+00 : f32
    %7 = vector.broadcast %cst_5 : f32 to vector<32x128xf32>
    %8 = arith.addf %7, %6 : vector<32x128xf32>
    %9 = tpu.reciprocal %8 {approx = true} : vector<32x128xf32> -> vector<32x128xf32>
    %10 = arith.mulf %3, %9 : vector<32x128xf32>
    %c0_6 = arith.constant 0 : index
    %c0_7 = arith.constant 0 : index
    %c0_8 = arith.constant 0 : index
    %11 = vector.load %arg4[%c0_6, %c0_7, %c0_8] : memref<1x32x128xf32, #tpu.memory_space<vmem>>, vector<1x32x128xf32>
    %12 = vector.shape_cast %11 : vector<1x32x128xf32> to vector<32x128xf32>
    %13 = vector.shape_cast %10 : vector<32x128xf32> to vector<1x32x128xf32>
    tpu.vector_store %arg4[%c0_6, %c0_7, %c0_8], %13 {strides = array<i32>} : memref<1x32x128xf32, #tpu.memory_space<vmem>>, vector<1x32x128xf32>,
    return
  }
  func.func @transform_0(%arg0: i32, %arg1: i32) -> (i32, i32) {
    %c0_i32 = arith.constant 0 : i32
    %c0_i32_0 = arith.constant 0 : i32
    %c0_i32_1 = arith.constant 0 : i32
    return %c0_i32, %c0_i32_0 : i32, i32
  }
  func.func @transform_1(%arg0: i32, %arg1: i32) -> (i32, i32, i32) {
    %c0_i32 = arith.constant 0 : i32
    %c0_i32_0 = arith.constant 0 : i32
    return %arg1, %c0_i32, %arg0 : i32, i32, i32
  }
  func.func @transform_2(%arg0: i32, %arg1: i32) -> (i32, i32, i32) {
    %c0_i32 = arith.constant 0 : i32
    %c0_i32_0 = arith.constant 0 : i32
    return %arg1, %c0_i32, %arg0 : i32, i32, i32
  }
}

</mosaic_0001>

<bundles_post_ra>
// kernel: tpu_custom_call.1
= control target key start
LH: loop header
LB: loop body
LE: loop exit
PB: predicated region body
PF: predicated region fallthrough
CT: control target
= control target key end

     0   :  { %7 = vsyncpa [#allocation3], 0  ;;  %s868_s0 = inlined_call_operand.hbm [shape: f32[32,64], index: 0, kind: input, shape index: {}]   ;;  %s869_s1 = inlined_call_operand.hbm [shape: f32[2,64,128], index: 1, kind: input, shape index: {}]   ;;  %s870_s2 = inlined_call_operand.hbm [shape: f32[2,32,128], index: 2, kind: output, shape index: {}]  }
   0x1   :  { %8 = vsyncpa [#allocation6], 0 }
   0x2   :  { %10 = vsyncpa [#allocation6 + $0x1], 0 }
   0x3   :  { %11 = vsyncpa [#allocation4], 0 }
   0x4   :  { %13 = vsyncpa [#allocation4 + $0x1], 0  ;;  %s702_s9 = smov 0   ;;  %s704_s10 = smov 0  }
   0x5   :  { %s706_s11 = smov 0   ;;  %s708_s12 = smov 0  }
   0x6   :  { %s710_s13 = smov 0   ;;  %s712_s14 = smov 0  }
   0x7 LB: > { %s394_s15 = sadd.s32 4294967295, %s680_s14   ;;  %s395_s16 = sadd.s32 4294967294, %s680_s14   ;;  %s680_s14 = sphi %s712_s14, %s19_s14   ;;  %s676_s13 = sphi %s710_s13, %s882_s13   ;;  %s672_s12 = sphi %s708_s12, %s881_s12   ;;  %s668_s11 = sphi %s706_s11, %s880_s11   ;;  %s664_s10 = sphi %s704_s10, %s879_s10   ;;  %s660_s9 = sphi %s702_s9, %s878_s9  }
   0x8   : > { %p74_p0 = scmp.ne.s32.totalorder %s664_s10, %s660_s9  ;;  %p736_p1 = scmp.eq.s32.totalorder %s394_s15, 0 }
   0x9   : > { %p740_p2 = scmp.eq.s32.totalorder %s394_s15, 1  ;;  %p106_p3 = scmp.eq.s32.totalorder %s395_s16, 1 }
   0xa   : > { %p746_p4 = por %p736_p1, %p74_p0  ;;  %p396_p5 = scmp.ge.s32.totalorder %s680_s14, 1 }
   0xb   : > { %p751_p6 = por %p106_p3, %p74_p0  ;;  %p113_p7 = scmp.lt.s32.totalorder %s680_s14, 3 }
   0xc   : > { %s124_s23 = sshll.u32 %s868_s0, 4  ;;  %s682_s25 = smov [#allocation2]   ;;  %s125_s23 = int_to_ptr.hbm [resolvable:$true] %s124_s23 }
   0xd   : > { %p759_p8 = pnand %p396_p5, %p113_p7  ;;  %s126_s26 = sshll.u32 %s682_s25, 4  ;;  %s127_s26 = int_to_ptr.vmem [resolvable:$true] %s126_s26 }
   0xe   : > { %p398_p11 = scmp.ge.s32.totalorder %s680_s14, 2  ;;  %s683_s27 = smov 128  }
   0xf   : > { %p449_p9 = pneg %p759_p8  ;;  %s684_s28 = smov 8  }
  0x10   : > { %s28_s29 = sadd.s32 1, %s676_s13  ;;  %s61_s30 = sadd.s32 1, %s668_s11 }
  0x11   : > { %p450_p10 = pnand %p449_p9, %p736_p1  ;;  %p29_p12 = scmp.ge.s32.totalorder %s28_s29, 2 }
  0x12   : > { %p68_p13 = scmp.ne.s32.totalorder %s668_s11, %s664_s10  ;;  %p69_p0 = scmp.eq.s32.totalorder %s680_s14, 0 }
  0x13   : > { %452 = dma.hbm_to_vmem [thread:$0]  (!%p450_p10), %s125_s23, 512, %s127_s26, [#allocation3], %s683_s27, %s683_s27, %s684_s28  }
  0x14   : > { %s884_s29 = smov (%p29_p12, %s28_s29), 0  ;;  %p778_p3 = por %p69_p0, %p68_p13 }
  0x15   : > { %p784_p5 = por %p740_p2, %p68_p13  ;;  %s56_s5 = ssub.s32 %s676_s13, %s884_s29 }
  0x16   : > { %p462_p7 = scmp.lt.s32.totalorder %s680_s14, 2  ;;  %p59_p9 = scmp.eq.s32.totalorder %s56_s5, 0 }
  0x17   : > { %s140_s6 = sand.u32 1, %s668_s11   ;;  %s415_s15 = sshll.u32 %s676_s13, 6 }
  0x18   : > { %s399_s7 = sshll.u32 %s140_s6, 6  ;;  %s150_s22 = scalar_lea.hbm %s869_s1, %s415_s15 }
  0x19   : > { %s793_s8 = scalar_select %p59_p9, %s668_s11, %s61_s30  }
  0x1a   : > { %s144_s23 = scalar_lea.vmem [#allocation5], %s399_s7  ;;  %s151_s18 = sshll.u32 %s150_s22, 4  ;;  %s152_s18 = int_to_ptr.hbm [resolvable:$true] %s151_s18 }
  0x1b   : > { %s153_s25 = sshll.u32 %s144_s23, 4  ;;  %p454_p2 = pnand %p462_p7, %p778_p3  ;;  %s154_s25 = int_to_ptr.vmem [resolvable:$true] %s153_s25 }
  0x1c   : > { %s141_s26 = scalar_lea.sflag [#allocation6], %s140_s6  ;;  %165 = sbr.rel (%p759_p8) target bundleno = 215 (0xd7), region = 28 }
  0x1d   : > { %456 = dma.hbm_to_vmem [thread:$0]  (!%p454_p2), %s152_s18, 1024, %s154_s25, %s141_s26, %s683_s27, %s683_s27, %s684_s28  }
  0x21   : > { %647 = dma.done.wait (%p736_p1), [#allocation3], 512  }
  0x22   : > { %649 = vsyncadd (%p736_p1), [#allocation3], 4294966784  ;;  %s811_s30 = sand.u32 1, %s664_s10  }
  0x23   : > { %s404_s3 = sshll.u32 %s811_s30, 6  ;;  %s173_s5 = scalar_lea.sflag [#allocation6], %s811_s30 }
  0x24   : > { %s815_s6 = scalar_lea.vmem [#allocation5], %s404_s3 }
  0x25   : > { %651 = dma.done.wait (%p746_p4), %s173_s5, 1024  }
  0x26   : > { %653 = vsyncadd (%p746_p4), %s173_s5, 4294966272  ;;  %v209_v0 = vld [vmem:[%s815_s6 + $0x38] sm:$0xff]  ;;  %v208_v1 = vld [vmem:[%s815_s6 + $0x30] sm:$0xff]  ;;  %vm210_vm0 = vcmask 523264   ;;  %s405_s17 = sshll.u32 %s811_s30, 5  ;;  %s416_s19 = sshll.u32 %s672_s12, 5 }
  0x27   : > { %231 = vmatpush.msra.mxu0 %v209_v0  ;;  %417 = vmatpush.msra.mxu1 %v209_v0  ;;  %v207_v2 = vld [vmem:[%s815_s6 + $0x28] sm:$0xff]  ;;  %v206_v3 = vld [vmem:[%s815_s6 + $0x20] sm:$0xff]  ;;  %v205_v4 = vld [vmem:[%s815_s6 + $0x18] sm:$0xff]  ;;  %s293_s28 = scalar_lea.hbm %s870_s2, %s416_s19  ;;  %s197_s7 = scalar_lea.vmem [#allocation7], %s405_s17 }
  0x28   : > { %418 = vmatpush.msra.mxu2 %v209_v0  ;;  %419 = vmatpush.msra.mxu3 %v209_v0  ;;  %v204_v5 = vld [vmem:[%s815_s6 + $0x10] sm:$0xff]  ;;  %v203_v6 = vld [vmem:[%s815_s6 + $0x8] sm:$0xff]  ;;  %v202_v7 = vld [vmem:[%s815_s6] sm:$0xff]  ;;  %s294_s15 = sshll.u32 %s197_s7, 4  ;;  %s296_s16 = sshll.u32 %s293_s28, 4  ;;  %s295_s15 = int_to_ptr.vmem [resolvable:$true] %s294_s15  ;;  %s297_s16 = int_to_ptr.hbm [resolvable:$true] %s296_s16 }
  0x29   : > { %232 = vmatpush.msra.mxu0 %v208_v1  ;;  %420 = vmatpush.msra.mxu1 %v208_v1  ;;  %v198_v8 = vld [vmem:[#allocation2] sm:$0xff]  ;;  %v199_v9 = vld [vmem:[#allocation2 + $0x8] sm:$0xff]  ;;  %v200_v10 = vld [vmem:[#allocation2 + $0x10] sm:$0xff]  ;;  %s281_s12 = scalar_lea.sflag [#allocation4], %s811_s30  ;;  %s608_s21 = sshra.s32 %s297_s16, 4  ;;  %s609_s21 = int_to_ptr.hbm [resolvable:$true] %s608_s21 }
  0x2a   : > { %421 = vmatpush.msra.mxu2 %v208_v1  ;;  %422 = vmatpush.msra.mxu3 %v208_v1  ;;  %v201_v11 = vld [vmem:[#allocation2 + $0x18] sm:$0xff]  ;;  %s610_s22 = scalar_lea.hbm %s609_s21, 32  ;;  %s614_s18 = scalar_lea.hbm %s870_s2, 64 }
  0x2b   : > { %233 = vmatpush.msra.mxu0 %v207_v2  ;;  %423 = vmatpush.msra.mxu1 %v207_v2  ;;  %p611_p1 = scmp.ne.s32.totalorder %s609_s21, %s610_s22  ;;  %p615_p10 = scmp.lt.s32.totalorder %s609_s21, %s870_s2 }
  0x2c   : > { %424 = vmatpush.msra.mxu2 %v207_v2  ;;  %425 = vmatpush.msra.mxu3 %v207_v2  ;;  %p616_p12 = scmp.lt.s32.totalorder %s614_s18, %s610_s22 }
  0x2d   : > { %234 = vmatpush.msra.mxu0 %v206_v3  ;;  %426 = vmatpush.msra.mxu1 %v206_v3  ;;  %p612_p4 = pnand %p611_p1, %p784_p5 }
  0x2e   : > { %427 = vmatpush.msra.mxu2 %v206_v3  ;;  %428 = vmatpush.msra.mxu3 %v206_v3  ;;  %p617_p13 = por %p616_p12, %p615_p10 }
  0x2f   : > { %235 = vmatpush.msra.mxu0 %v205_v4  ;;  %429 = vmatpush.msra.mxu1 %v205_v4  ;;  %p613_p8 = pneg %p612_p4 }
  0x30   : > { %430 = vmatpush.msra.mxu2 %v205_v4  ;;  %431 = vmatpush.msra.mxu3 %v205_v4 }
  0x31   : > { %236 = vmatpush.msra.mxu0 %v204_v5  ;;  %432 = vmatpush.msra.mxu1 %v204_v5  ;;  %p618_p0 = pnand %p617_p13, %p613_p8 }
  0x32   : > { %433 = vmatpush.msra.mxu2 %v204_v5  ;;  %434 = vmatpush.msra.mxu3 %v204_v5 }
  0x33   : > { %237 = vmatpush.msra.mxu0 %v203_v6  ;;  %435 = vmatpush.msra.mxu1 %v203_v6 }
  0x34   : > { %436 = vmatpush.msra.mxu2 %v203_v6  ;;  %437 = vmatpush.msra.mxu3 %v203_v6 }
  0x35   : > { %238 = vmatpush.msra.mxu0 %v202_v7  ;;  %438 = vmatpush.msra.mxu1 %v202_v7 }
  0x36   : > { %439 = vmatpush.msra.mxu2 %v202_v7  ;;  %440 = vmatpush.msra.mxu3 %v202_v7 }
  0x37   : > { %406 = vmatmul.msk.f32.vlgmr.msra.gmra.mxu0 %vm210_vm0, %v198_v8  ;;  %407 = vmatmul.msk.f32.vlgmr.msra.gmra.mxu1 %vm210_vm0, %v199_v9 }
  0x38   : > { %408 = vmatmul.msk.f32.vlgmr.msra.gmra.mxu2 %vm210_vm0, %v200_v10  ;;  %409 = vmatmul.msk.f32.vlgmr.msra.gmra.mxu3 %vm210_vm0, %v201_v11 }
  0xb4   : > { %v240_v12 = vpop.f32.mrf.mxu0  ;;  %v243_v13 = vpop.f32.mrf.mxu1 }
  0xb5   : > { %v252_v14 = vsub.f32 0.0, %v240_v12  ;;  %v253_v15 = vsub.f32 0.0, %v243_v13 }
  0xb7   : > { %v256_v16 = vmul.f32 1.442695, %v252_v14  ;;  %v258_v17 = vmul.f32 1.442695, %v253_v15 }
  0xb9   : > { %518 = vpow2.f32 %v256_v16 }
  0xba   : > { %520 = vpow2.f32 %v258_v17 }
  0xbb   : > { %v246_v18 = vpop.f32.mrf.mxu2  ;;  %v249_v19 = vpop.f32.mrf.mxu3 }
  0xbc   : > { %v254_v20 = vsub.f32 0.0, %v246_v18  ;;  %v255_v21 = vsub.f32 0.0, %v249_v19 }
  0xbe   : > { %v260_v22 = vmul.f32 1.442695, %v254_v20  ;;  %v262_v23 = vmul.f32 1.442695, %v255_v21 }
  0xbf   : > { %v519_v24 = vpop.eup %518 }
  0xc0   : > { %v521_v25 = vpop.eup %520  ;;  %v264_v26 = vadd.f32 1.0, %v519_v24  ;;  %522 = vpow2.f32 %v260_v22 }
  0xc1   : > { %v265_v27 = vadd.f32 1.0, %v521_v25  ;;  %524 = vpow2.f32 %v262_v23 }
  0xc2   : > { %526 = vrcp.f32 %v264_v26 }
  0xc3   : > { %528 = vrcp.f32 %v265_v27 }
  0xc6   : > { %v523_v28 = vpop.eup %522 }
  0xc7   : > { %v525_v29 = vpop.eup %524  ;;  %v266_v30 = vadd.f32 1.0, %v523_v28 }
  0xc8   : > { %v527_v31 = vpop.eup %526  ;;  %v267_v32 = vadd.f32 1.0, %v525_v29 }
  0xc9   : > { %v529_v33 = vpop.eup %528  ;;  %v272_v34 = vmul.f32 %v527_v31, %v240_v12  ;;  %530 = vrcp.f32 %v266_v30 }
  0xca   : > { %v273_v35 = vmul.f32 %v529_v33, %v243_v13  ;;  %532 = vrcp.f32 %v267_v32 }
  0xcb   : > { %276 = vst [vmem:[%s197_s7] sm:$0xff] %v272_v34 }
  0xcc   : > { %277 = vst [vmem:[%s197_s7 + $0x8] sm:$0xff] %v273_v35 }
  0xcf   : > { %v531_v36 = vpop.eup %530 }
  0xd0   : > { %v533_v37 = vpop.eup %532  ;;  %v274_v38 = vmul.f32 %v531_v36, %v246_v18 }
  0xd1   : > { %v275_v39 = vmul.f32 %v533_v37, %v249_v19 }
  0xd2   : > { %278 = vst [vmem:[%s197_s7 + $0x10] sm:$0xff] %v274_v38 }
  0xd3   : > { %279 = vst [vmem:[%s197_s7 + $0x18] sm:$0xff] %v275_v39 }
  0xd4   : > { %621 = shalt.err (!%p618_p0)
}
  0xd5   : > { %s685_s30 = smov 128   ;;  %s686_s5 = smov 8  }
  0xd6   : > { %447 = dma.vmem_to_hbm [thread:$0]  (%p784_p5), %s295_s15, 512, %s297_s16, %s281_s12, %s685_s30, %s685_s30, %s686_s5  }
  0xd7 PF: > { %s311_s6 = sand.u32 1, %s660_s9   ;;  %p458_p3 = pnand %p398_p11, %p751_p6 }
  0xd8   : > { %s312_s17 = scalar_lea.sflag [#allocation4], %s311_s6 }
  0xd9   : > { %p459_p7 = pneg %p458_p3 }
  0xdb   : > { %655 = dma.done.wait (%p459_p7), %s312_s17, 512  }
  0xdc   : > { %657 = vsyncadd (%p459_p7), %s312_s17, 4294966784  ;;  %s19_s14 = sadd.s32 1, %s680_s14   ;;  %s878_s9 = smov %s664_s10 }
  0xdd   : > { %p16_p9 = scmp.ge.s32.totalorder %s19_s14, 4   ;;  %s879_s10 = smov %s668_s11 }
  0xde   : > { %s880_s11 = smov %s793_s8  ;;  %s881_s12 = smov %s676_s13 }
  0xdf   : > { %s882_s13 = smov %s884_s29  ;;  %18 = sbr.rel (!%p16_p9) target bundleno = 7 (0x7), region = 78 }
  0xe4   :  { %318 = vsyncpa [#allocation3], 1 }
  0xe5   :  { %320 = vsyncpa [#allocation3 + $0x1], 1 }
  0xe6   :  { %321 = vsyncpa [#allocation6], 1 }
  0xe7   :  { %323 = vsyncpa [#allocation6 + $0x1], 1 }
  0xe8   :  { %324 = vsyncpa [#allocation4], 1 }
  0xe9   :  { %326 = vsyncpa [#allocation4 + $0x1], 1 }

</bundles_post_ra>
